<compile_context>
chip_gen: v6e
topology: v6e:2x2x1
jax: 0.10.0
libtpu: 0.0.40
codegen_flags: <defaults>
</compile_context>

<pallas_src>
import jax
import jax.numpy as jnp
from jax.experimental import pallas as pl
from jax.experimental.pallas import tpu as pltpu

_LEAKY_SLOPE = 0.2
_LANE_CHUNK = 512  # per-chunk lane width inside the kernel (register-pressure cap)


def _pick_chunk(tile_m):
    for c in (_LANE_CHUNK, 256, 128):
        if tile_m % c == 0:
            return c
    return tile_m  # small / odd tile: single chunk


def ff_rezero_residual_kernel(w1_ref, b1_ref, w2g_ref, b2g_ref, x_ref, o_ref):
    # w1_ref : SMEM (C_in, C_hid)   first 1x1 conv weights
    # b1_ref : SMEM (C_hid,)        first 1x1 conv bias
    # w2g_ref: SMEM (C_hid, C_out)  second 1x1 conv weights, pre-scaled by g
    # b2g_ref: SMEM (C_out,)        second 1x1 conv bias, pre-scaled by g
    # x_ref  : VMEM (1, C_in, TM)   lane-dense input tile (lanes = spatial)
    # o_ref  : VMEM (1, C_out, TM)  output tile, same dtype as x
    c_in = x_ref.shape[1]
    c_out = o_ref.shape[1]
    c_hid = w1_ref.shape[1]
    tm = x_ref.shape[2]

    chunk = _pick_chunk(tm)
    n_chunks = tm // chunk

    @pl.loop(0, n_chunks)
    def _(j):
        base = pl.multiple_of(j * chunk, chunk)
        # Re-load x rows per chunk (vld slots are idle under the DMA bound);
        # keeps live vregs ~ (2*C_in + 1) * chunk/128 << 64 even for big tiles.
        xs = [
            x_ref[0, ci:ci + 1, pl.ds(base, chunk)].astype(jnp.float32)
            for ci in range(c_in)
        ]
        # Output accumulators start from the residual (x itself) + g*b2.
        accs = [xs[co] + b2g_ref[co] for co in range(c_out)]
        # Hidden channels computed one at a time; contribution scattered into accs.
        for ch in range(c_hid):
            h = xs[0] * w1_ref[0, ch]
            for ci in range(1, c_in):
                h = h + xs[ci] * w1_ref[ci, ch]
            h = h + b1_ref[ch]
            h = jnp.where(h > 0, h, h * _LEAKY_SLOPE)  # LeakyReLU(0.2)
            for co in range(c_out):
                accs[co] = accs[co] + h * w2g_ref[ch, co]
        # Stores interleaved with the chunk loop (few masked sublane stores per
        # chunk; pure filler under the HBM bound).
        for co in range(c_out):
            o_ref[0, co:co + 1, pl.ds(base, chunk)] = accs[co].astype(o_ref.dtype)


def ff_residual_rezero(x_nchw, w1, b1, w2, b2, g, *,
                       tile_m=None, target_step_bytes=2 << 20):
    """out = x + g * (conv1x1_2(leaky_relu(conv1x1_1(x) + b1)) + b2).

    x_nchw: [N, C, H, W] (f32 or bf16); w1: [C, C_hid]; b1: [C_hid];
    w2: [C_hid, C]; b2: [C]; g: [1].  Returns [N, C, H, W] in x.dtype.
    """
    N, C, H, W = x_nchw.shape
    C_hid = w1.shape[1]
    assert w1.shape == (C, C_hid) and w2.shape == (C_hid, C)
    HW = H * W
    out_dtype = x_nchw.dtype
    itemsize = jnp.dtype(out_dtype).itemsize

    # Pure reshape (no transpose): NCHW -> [N, C, H*W]; lane dim = spatial.
    x3d = x_nchw.reshape(N, C, HW)

    # Fold the Rezero gain into the second conv once (tiny XLA op):
    #   g * (W2 h + b2) = (g W2) h + (g b2).
    gf = g.reshape(()).astype(jnp.float32)
    w1f = w1.astype(jnp.float32)
    b1f = b1.astype(jnp.float32)
    w2g = w2.astype(jnp.float32) * gf
    b2g = b2.astype(jnp.float32) * gf

    # --- spatial tile from a per-step byte budget (~2 MiB of in+out payload) ---
    if tile_m is None:
        bytes_per_lane = itemsize * (C + C)            # x read + out write
        target_tm = max(128, target_step_bytes // bytes_per_lane)
        if HW <= target_tm:
            tile_m = HW                                # whole row: contiguous DMA
        else:
            tile_m = None
            for mult in (_LANE_CHUNK, 256, 128):       # lane-dense & chunkable
                cand = (target_tm // mult) * mult
                while cand >= mult:
                    if HW % cand == 0:
                        tile_m = cand
                        break
                    cand -= mult
                if tile_m is not None:
                    break
            if tile_m is None:
                tile_m = HW                            # odd HW: full row (correct)
    n_tiles = HW // tile_m

    # Keep >= 2 grid steps so both v7x TensorCores get work.
    if N * n_tiles < 2 and HW % 256 == 0:
        tile_m = HW // 2
        n_tiles = 2

    # VMEM limit from the actual double-buffered footprint + slack; stays well
    # under v7x's 32 MiB scoped / 64 MiB physical VMEM.
    tile_bytes = itemsize * tile_m * (C + C)           # in + out per step
    vmem_limit = min(max(8 << 20, 2 * tile_bytes + (4 << 20)), 28 << 20)

    cost = pl.CostEstimate(
        flops=int(N * HW * (2 * C * C_hid + 2 * C_hid * C + 2 * C + C_hid)),
        transcendentals=0,
        bytes_accessed=int(itemsize * 2 * N * C * HW
                           + 4 * (C * C_hid + C_hid + C_hid * C + C)),
    )

    out3d = pl.pallas_call(
        ff_rezero_residual_kernel,
        out_shape=jax.ShapeDtypeStruct((N, C, HW), out_dtype),
        grid=(N, n_tiles),
        in_specs=[
            pl.BlockSpec(memory_space=pltpu.MemorySpace.SMEM),        # w1
            pl.BlockSpec(memory_space=pltpu.MemorySpace.SMEM),        # b1
            pl.BlockSpec(memory_space=pltpu.MemorySpace.SMEM),        # w2 * g
            pl.BlockSpec(memory_space=pltpu.MemorySpace.SMEM),        # b2 * g
            pl.BlockSpec((1, C, tile_m), lambda n, t: (n, 0, t)),     # x
        ],
        out_specs=pl.BlockSpec((1, C, tile_m), lambda n, t: (n, 0, t)),
        compiler_params=pltpu.CompilerParams(
            dimension_semantics=("parallel", "parallel"),
            vmem_limit_bytes=int(vmem_limit),
        ),
        cost_estimate=cost,
    )(w1f, b1f, w2g, b2g, x3d)

    return out3d.reshape(N, C, H, W)


if __name__ == "__main__":
    key = jax.random.PRNGKey(0)
    kx, k1, kb1, k2, kb2 = jax.random.split(key, 5)

    N, C, H, W = 2, 4, 16, 16
    C_hid = 2 * C
    x = jax.random.normal(kx, (N, C, H, W), dtype=jnp.float32)
    w1 = jax.random.normal(k1, (C, C_hid), dtype=jnp.float32) * 0.2
    b1 = jax.random.normal(kb1, (C_hid,), dtype=jnp.float32) * 0.1
    w2 = jax.random.normal(k2, (C_hid, C), dtype=jnp.float32) * 0.2
    b2 = jax.random.normal(kb2, (C,), dtype=jnp.float32) * 0.1

    def ref_ff(x, w1, b1, w2, b2, g):
        xf = x.astype(jnp.float32)
        h = jnp.einsum("nchw,cd->ndhw", xf, w1) + b1[None, :, None, None]
        h = jnp.where(h > 0, h, _LEAKY_SLOPE * h)
        y = jnp.einsum("ndhw,dc->nchw", h, w2) + b2[None, :, None, None]
        return xf + y * g[0]

    # (1) Non-zero gain: exercises conv1 + leaky_relu + conv2 + rezero + residual.
    g = jnp.array([0.37], dtype=jnp.float32)
    out = jax.block_until_ready(ff_residual_rezero(x, w1, b1, w2, b2, g))
    ref = ref_ff(x, w1, b1, w2, b2, g)
    assert out.shape == (N, C, H, W) and out.dtype == x.dtype
    assert jnp.allclose(out, ref, atol=1e-5, rtol=1e-5)

    # (2) bf16 I/O path (halved HBM traffic); params stay f32, acc in f32.
    xb = x.astype(jnp.bfloat16)
    outb = jax.block_until_ready(ff_residual_rezero(xb, w1, b1, w2, b2, g))
    assert outb.dtype == jnp.bfloat16
    refb = ref_ff(xb, w1, b1, w2, b2, g)
    assert jnp.allclose(outb.astype(jnp.float32), refb, atol=3e-2, rtol=3e-2)

    # (3) Rezero init (g == 0): block reduces to identity (x + 0).
    g0 = jnp.zeros((1,), dtype=jnp.float32)
    out0 = jax.block_until_ready(ff_residual_rezero(x, w1, b1, w2, b2, g0))
    assert jnp.allclose(out0, x)

    print("KERNEL_OK")
</pallas_src>

<mosaic_0001>
module attributes {stable_mosaic.version = 11 : i64} {
  func.func @ff_rezero_residual_kernel(%arg0: i32, %arg1: i32, %arg2: memref<4x8xf32, #tpu.memory_space<smem>>, %arg3: memref<8xf32, #tpu.memory_space<smem>>, %arg4: memref<8x4xf32, #tpu.memory_space<smem>>, %arg5: memref<4xf32, #tpu.memory_space<smem>>, %arg6: memref<1x4x256xf32, #tpu.memory_space<vmem>>, %arg7: memref<1x4x256xf32, #tpu.memory_space<vmem>>) attributes {dimension_semantics = [#tpu.dimension_semantics<parallel>, #tpu.dimension_semantics<parallel>], iteration_bounds = array<i64: 2, 1>, scalar_prefetch = 0 : i64, scratch_operands = 0 : i64, tpu.core_type = #tpu.core_type<tc>, window_params = [{transform_indices = @transform_0, window_bounds = array<i64: 4, 8>}, {transform_indices = @transform_1, window_bounds = array<i64: 8>}, {transform_indices = @transform_2, window_bounds = array<i64: 8, 4>}, {transform_indices = @transform_3, window_bounds = array<i64: 4>}, {transform_indices = @transform_4, window_bounds = array<i64: 1, 4, 256>}, {transform_indices = @transform_5, window_bounds = array<i64: 1, 4, 256>}]} {
    %c0_i32 = arith.constant 0 : i32
    %c1_i32 = arith.constant 1 : i32
    %0 = arith.muli %c0_i32, %c1_i32 : i32
    %c0_i32_0 = arith.constant 0 : i32
    %1 = arith.addi %c0_i32_0, %0 : i32
    %c256_i32 = arith.constant 256 : i32
    %2 = arith.muli %1, %c256_i32 : i32
    %3 = tpu.assume_multiple %2, 256 : i32
    %c0 = arith.constant 0 : index
    %c0_1 = arith.constant 0 : index
    %4 = arith.index_cast %3 : i32 to index
    %5 = vector.load %arg6[%c0, %c0_1, %4] : memref<1x4x256xf32, #tpu.memory_space<vmem>>, vector<1x1x256xf32>
    %6 = vector.shape_cast %5 : vector<1x1x256xf32> to vector<1x256xf32>
    %c0_2 = arith.constant 0 : index
    %c1 = arith.constant 1 : index
    %7 = arith.index_cast %3 : i32 to index
    %8 = vector.load %arg6[%c0_2, %c1, %7] : memref<1x4x256xf32, #tpu.memory_space<vmem>>, vector<1x1x256xf32>
    %9 = vector.shape_cast %8 : vector<1x1x256xf32> to vector<1x256xf32>
    %c0_3 = arith.constant 0 : index
    %c2 = arith.constant 2 : index
    %10 = arith.index_cast %3 : i32 to index
    %11 = vector.load %arg6[%c0_3, %c2, %10] : memref<1x4x256xf32, #tpu.memory_space<vmem>>, vector<1x1x256xf32>
    %12 = vector.shape_cast %11 : vector<1x1x256xf32> to vector<1x256xf32>
    %c0_4 = arith.constant 0 : index
    %c3 = arith.constant 3 : index
    %13 = arith.index_cast %3 : i32 to index
    %14 = vector.load %arg6[%c0_4, %c3, %13] : memref<1x4x256xf32, #tpu.memory_space<vmem>>, vector<1x1x256xf32>
    %15 = vector.shape_cast %14 : vector<1x1x256xf32> to vector<1x256xf32>
    %c0_5 = arith.constant 0 : index
    %16 = memref.load %arg5[%c0_5] : memref<4xf32, #tpu.memory_space<smem>>
    %17 = vector.broadcast %16 : f32 to vector<1x256xf32>
    %18 = arith.addf %6, %17 : vector<1x256xf32>
    %c1_6 = arith.constant 1 : index
    %19 = memref.load %arg5[%c1_6] : memref<4xf32, #tpu.memory_space<smem>>
    %20 = vector.broadcast %19 : f32 to vector<1x256xf32>
    %21 = arith.addf %9, %20 : vector<1x256xf32>
    %c2_7 = arith.constant 2 : index
    %22 = memref.load %arg5[%c2_7] : memref<4xf32, #tpu.memory_space<smem>>
    %23 = vector.broadcast %22 : f32 to vector<1x256xf32>
    %24 = arith.addf %12, %23 : vector<1x256xf32>
    %c3_8 = arith.constant 3 : index
    %25 = memref.load %arg5[%c3_8] : memref<4xf32, #tpu.memory_space<smem>>
    %26 = vector.broadcast %25 : f32 to vector<1x256xf32>
    %27 = arith.addf %15, %26 : vector<1x256xf32>
    %c0_9 = arith.constant 0 : index
    %c0_10 = arith.constant 0 : index
    %28 = memref.load %arg2[%c0_9, %c0_10] : memref<4x8xf32, #tpu.memory_space<smem>>
    %29 = vector.broadcast %28 : f32 to vector<1x256xf32>
    %30 = arith.mulf %6, %29 : vector<1x256xf32>
    %c1_11 = arith.constant 1 : index
    %c0_12 = arith.constant 0 : index
    %31 = memref.load %arg2[%c1_11, %c0_12] : memref<4x8xf32, #tpu.memory_space<smem>>
    %32 = vector.broadcast %31 : f32 to vector<1x256xf32>
    %33 = arith.mulf %9, %32 : vector<1x256xf32>
    %34 = arith.addf %30, %33 : vector<1x256xf32>
    %c2_13 = arith.constant 2 : index
    %c0_14 = arith.constant 0 : index
    %35 = memref.load %arg2[%c2_13, %c0_14] : memref<4x8xf32, #tpu.memory_space<smem>>
    %36 = vector.broadcast %35 : f32 to vector<1x256xf32>
    %37 = arith.mulf %12, %36 : vector<1x256xf32>
    %38 = arith.addf %34, %37 : vector<1x256xf32>
    %c3_15 = arith.constant 3 : index
    %c0_16 = arith.constant 0 : index
    %39 = memref.load %arg2[%c3_15, %c0_16] : memref<4x8xf32, #tpu.memory_space<smem>>
    %40 = vector.broadcast %39 : f32 to vector<1x256xf32>
    %41 = arith.mulf %15, %40 : vector<1x256xf32>
    %42 = arith.addf %38, %41 : vector<1x256xf32>
    %c0_17 = arith.constant 0 : index
    %43 = memref.load %arg3[%c0_17] : memref<8xf32, #tpu.memory_space<smem>>
    %44 = vector.broadcast %43 : f32 to vector<1x256xf32>
    %45 = arith.addf %42, %44 : vector<1x256xf32>
    %cst = arith.constant 0.000000e+00 : f32
    %46 = vector.broadcast %cst : f32 to vector<1x256xf32>
    %47 = arith.cmpf ogt, %45, %46 : vector<1x256xf32>
    %cst_18 = arith.constant 2.000000e-01 : f32
    %48 = vector.broadcast %cst_18 : f32 to vector<1x256xf32>
    %49 = arith.mulf %45, %48 : vector<1x256xf32>
    %50 = arith.select %47, %45, %49 : vector<1x256xi1>, vector<1x256xf32>
    %c0_19 = arith.constant 0 : index
    %c0_20 = arith.constant 0 : index
    %51 = memref.load %arg4[%c0_19, %c0_20] : memref<8x4xf32, #tpu.memory_space<smem>>
    %52 = vector.broadcast %51 : f32 to vector<1x256xf32>
    %53 = arith.mulf %50, %52 : vector<1x256xf32>
    %54 = arith.addf %18, %53 : vector<1x256xf32>
    %c0_21 = arith.constant 0 : index
    %c1_22 = arith.constant 1 : index
    %55 = memref.load %arg4[%c0_21, %c1_22] : memref<8x4xf32, #tpu.memory_space<smem>>
    %56 = vector.broadcast %55 : f32 to vector<1x256xf32>
    %57 = arith.mulf %50, %56 : vector<1x256xf32>
    %58 = arith.addf %21, %57 : vector<1x256xf32>
    %c0_23 = arith.constant 0 : index
    %c2_24 = arith.constant 2 : index
    %59 = memref.load %arg4[%c0_23, %c2_24] : memref<8x4xf32, #tpu.memory_space<smem>>
    %60 = vector.broadcast %59 : f32 to vector<1x256xf32>
    %61 = arith.mulf %50, %60 : vector<1x256xf32>
    %62 = arith.addf %24, %61 : vector<1x256xf32>
    %c0_25 = arith.constant 0 : index
    %c3_26 = arith.constant 3 : index
    %63 = memref.load %arg4[%c0_25, %c3_26] : memref<8x4xf32, #tpu.memory_space<smem>>
    %64 = vector.broadcast %63 : f32 to vector<1x256xf32>
    %65 = arith.mulf %50, %64 : vector<1x256xf32>
    %66 = arith.addf %27, %65 : vector<1x256xf32>
    %c0_27 = arith.constant 0 : index
    %c1_28 = arith.constant 1 : index
    %67 = memref.load %arg2[%c0_27, %c1_28] : memref<4x8xf32, #tpu.memory_space<smem>>
    %68 = vector.broadcast %67 : f32 to vector<1x256xf32>
    %69 = arith.mulf %6, %68 : vector<1x256xf32>
    %c1_29 = arith.constant 1 : index
    %c1_30 = arith.constant 1 : index
    %70 = memref.load %arg2[%c1_29, %c1_30] : memref<4x8xf32, #tpu.memory_space<smem>>
    %71 = vector.broadcast %70 : f32 to vector<1x256xf32>
    %72 = arith.mulf %9, %71 : vector<1x256xf32>
    %73 = arith.addf %69, %72 : vector<1x256xf32>
    %c2_31 = arith.constant 2 : index
    %c1_32 = arith.constant 1 : index
    %74 = memref.load %arg2[%c2_31, %c1_32] : memref<4x8xf32, #tpu.memory_space<smem>>
    %75 = vector.broadcast %74 : f32 to vector<1x256xf32>
    %76 = arith.mulf %12, %75 : vector<1x256xf32>
    %77 = arith.addf %73, %76 : vector<1x256xf32>
    %c3_33 = arith.constant 3 : index
    %c1_34 = arith.constant 1 : index
    %78 = memref.load %arg2[%c3_33, %c1_34] : memref<4x8xf32, #tpu.memory_space<smem>>
    %79 = vector.broadcast %78 : f32 to vector<1x256xf32>
    %80 = arith.mulf %15, %79 : vector<1x256xf32>
    %81 = arith.addf %77, %80 : vector<1x256xf32>
    %c1_35 = arith.constant 1 : index
    %82 = memref.load %arg3[%c1_35] : memref<8xf32, #tpu.memory_space<smem>>
    %83 = vector.broadcast %82 : f32 to vector<1x256xf32>
    %84 = arith.addf %81, %83 : vector<1x256xf32>
    %cst_36 = arith.constant 0.000000e+00 : f32
    %85 = vector.broadcast %cst_36 : f32 to vector<1x256xf32>
    %86 = arith.cmpf ogt, %84, %85 : vector<1x256xf32>
    %cst_37 = arith.constant 2.000000e-01 : f32
    %87 = vector.broadcast %cst_37 : f32 to vector<1x256xf32>
    %88 = arith.mulf %84, %87 : vector<1x256xf32>
    %89 = arith.select %86, %84, %88 : vector<1x256xi1>, vector<1x256xf32>
    %c1_38 = arith.constant 1 : index
    %c0_39 = arith.constant 0 : index
    %90 = memref.load %arg4[%c1_38, %c0_39] : memref<8x4xf32, #tpu.memory_space<smem>>
    %91 = vector.broadcast %90 : f32 to vector<1x256xf32>
    %92 = arith.mulf %89, %91 : vector<1x256xf32>
    %93 = arith.addf %54, %92 : vector<1x256xf32>
    %c1_40 = arith.constant 1 : index
    %c1_41 = arith.constant 1 : index
    %94 = memref.load %arg4[%c1_40, %c1_41] : memref<8x4xf32, #tpu.memory_space<smem>>
    %95 = vector.broadcast %94 : f32 to vector<1x256xf32>
    %96 = arith.mulf %89, %95 : vector<1x256xf32>
    %97 = arith.addf %58, %96 : vector<1x256xf32>
    %c1_42 = arith.constant 1 : index
    %c2_43 = arith.constant 2 : index
    %98 = memref.load %arg4[%c1_42, %c2_43] : memref<8x4xf32, #tpu.memory_space<smem>>
    %99 = vector.broadcast %98 : f32 to vector<1x256xf32>
    %100 = arith.mulf %89, %99 : vector<1x256xf32>
    %101 = arith.addf %62, %100 : vector<1x256xf32>
    %c1_44 = arith.constant 1 : index
    %c3_45 = arith.constant 3 : index
    %102 = memref.load %arg4[%c1_44, %c3_45] : memref<8x4xf32, #tpu.memory_space<smem>>
    %103 = vector.broadcast %102 : f32 to vector<1x256xf32>
    %104 = arith.mulf %89, %103 : vector<1x256xf32>
    %105 = arith.addf %66, %104 : vector<1x256xf32>
    %c0_46 = arith.constant 0 : index
    %c2_47 = arith.constant 2 : index
    %106 = memref.load %arg2[%c0_46, %c2_47] : memref<4x8xf32, #tpu.memory_space<smem>>
    %107 = vector.broadcast %106 : f32 to vector<1x256xf32>
    %108 = arith.mulf %6, %107 : vector<1x256xf32>
    %c1_48 = arith.constant 1 : index
    %c2_49 = arith.constant 2 : index
    %109 = memref.load %arg2[%c1_48, %c2_49] : memref<4x8xf32, #tpu.memory_space<smem>>
    %110 = vector.broadcast %109 : f32 to vector<1x256xf32>
    %111 = arith.mulf %9, %110 : vector<1x256xf32>
    %112 = arith.addf %108, %111 : vector<1x256xf32>
    %c2_50 = arith.constant 2 : index
    %c2_51 = arith.constant 2 : index
    %113 = memref.load %arg2[%c2_50, %c2_51] : memref<4x8xf32, #tpu.memory_space<smem>>
    %114 = vector.broadcast %113 : f32 to vector<1x256xf32>
    %115 = arith.mulf %12, %114 : vector<1x256xf32>
    %116 = arith.addf %112, %115 : vector<1x256xf32>
    %c3_52 = arith.constant 3 : index
    %c2_53 = arith.constant 2 : index
    %117 = memref.load %arg2[%c3_52, %c2_53] : memref<4x8xf32, #tpu.memory_space<smem>>
    %118 = vector.broadcast %117 : f32 to vector<1x256xf32>
    %119 = arith.mulf %15, %118 : vector<1x256xf32>
    %120 = arith.addf %116, %119 : vector<1x256xf32>
    %c2_54 = arith.constant 2 : index
    %121 = memref.load %arg3[%c2_54] : memref<8xf32, #tpu.memory_space<smem>>
    %122 = vector.broadcast %121 : f32 to vector<1x256xf32>
    %123 = arith.addf %120, %122 : vector<1x256xf32>
    %cst_55 = arith.constant 0.000000e+00 : f32
    %124 = vector.broadcast %cst_55 : f32 to vector<1x256xf32>
    %125 = arith.cmpf ogt, %123, %124 : vector<1x256xf32>
    %cst_56 = arith.constant 2.000000e-01 : f32
    %126 = vector.broadcast %cst_56 : f32 to vector<1x256xf32>
    %127 = arith.mulf %123, %126 : vector<1x256xf32>
    %128 = arith.select %125, %123, %127 : vector<1x256xi1>, vector<1x256xf32>
    %c2_57 = arith.constant 2 : index
    %c0_58 = arith.constant 0 : index
    %129 = memref.load %arg4[%c2_57, %c0_58] : memref<8x4xf32, #tpu.memory_space<smem>>
    %130 = vector.broadcast %129 : f32 to vector<1x256xf32>
    %131 = arith.mulf %128, %130 : vector<1x256xf32>
    %132 = arith.addf %93, %131 : vector<1x256xf32>
    %c2_59 = arith.constant 2 : index
    %c1_60 = arith.constant 1 : index
    %133 = memref.load %arg4[%c2_59, %c1_60] : memref<8x4xf32, #tpu.memory_space<smem>>
    %134 = vector.broadcast %133 : f32 to vector<1x256xf32>
    %135 = arith.mulf %128, %134 : vector<1x256xf32>
    %136 = arith.addf %97, %135 : vector<1x256xf32>
    %c2_61 = arith.constant 2 : index
    %c2_62 = arith.constant 2 : index
    %137 = memref.load %arg4[%c2_61, %c2_62] : memref<8x4xf32, #tpu.memory_space<smem>>
    %138 = vector.broadcast %137 : f32 to vector<1x256xf32>
    %139 = arith.mulf %128, %138 : vector<1x256xf32>
    %140 = arith.addf %101, %139 : vector<1x256xf32>
    %c2_63 = arith.constant 2 : index
    %c3_64 = arith.constant 3 : index
    %141 = memref.load %arg4[%c2_63, %c3_64] : memref<8x4xf32, #tpu.memory_space<smem>>
    %142 = vector.broadcast %141 : f32 to vector<1x256xf32>
    %143 = arith.mulf %128, %142 : vector<1x256xf32>
    %144 = arith.addf %105, %143 : vector<1x256xf32>
    %c0_65 = arith.constant 0 : index
    %c3_66 = arith.constant 3 : index
    %145 = memref.load %arg2[%c0_65, %c3_66] : memref<4x8xf32, #tpu.memory_space<smem>>
    %146 = vector.broadcast %145 : f32 to vector<1x256xf32>
    %147 = arith.mulf %6, %146 : vector<1x256xf32>
    %c1_67 = arith.constant 1 : index
    %c3_68 = arith.constant 3 : index
    %148 = memref.load %arg2[%c1_67, %c3_68] : memref<4x8xf32, #tpu.memory_space<smem>>
    %149 = vector.broadcast %148 : f32 to vector<1x256xf32>
    %150 = arith.mulf %9, %149 : vector<1x256xf32>
    %151 = arith.addf %147, %150 : vector<1x256xf32>
    %c2_69 = arith.constant 2 : index
    %c3_70 = arith.constant 3 : index
    %152 = memref.load %arg2[%c2_69, %c3_70] : memref<4x8xf32, #tpu.memory_space<smem>>
    %153 = vector.broadcast %152 : f32 to vector<1x256xf32>
    %154 = arith.mulf %12, %153 : vector<1x256xf32>
    %155 = arith.addf %151, %154 : vector<1x256xf32>
    %c3_71 = arith.constant 3 : index
    %c3_72 = arith.constant 3 : index
    %156 = memref.load %arg2[%c3_71, %c3_72] : memref<4x8xf32, #tpu.memory_space<smem>>
    %157 = vector.broadcast %156 : f32 to vector<1x256xf32>
    %158 = arith.mulf %15, %157 : vector<1x256xf32>
    %159 = arith.addf %155, %158 : vector<1x256xf32>
    %c3_73 = arith.constant 3 : index
    %160 = memref.load %arg3[%c3_73] : memref<8xf32, #tpu.memory_space<smem>>
    %161 = vector.broadcast %160 : f32 to vector<1x256xf32>
    %162 = arith.addf %159, %161 : vector<1x256xf32>
    %cst_74 = arith.constant 0.000000e+00 : f32
    %163 = vector.broadcast %cst_74 : f32 to vector<1x256xf32>
    %164 = arith.cmpf ogt, %162, %163 : vector<1x256xf32>
    %cst_75 = arith.constant 2.000000e-01 : f32
    %165 = vector.broadcast %cst_75 : f32 to vector<1x256xf32>
    %166 = arith.mulf %162, %165 : vector<1x256xf32>
    %167 = arith.select %164, %162, %166 : vector<1x256xi1>, vector<1x256xf32>
    %c3_76 = arith.constant 3 : index
    %c0_77 = arith.constant 0 : index
    %168 = memref.load %arg4[%c3_76, %c0_77] : memref<8x4xf32, #tpu.memory_space<smem>>
    %169 = vector.broadcast %168 : f32 to vector<1x256xf32>
    %170 = arith.mulf %167, %169 : vector<1x256xf32>
    %171 = arith.addf %132, %170 : vector<1x256xf32>
    %c3_78 = arith.constant 3 : index
    %c1_79 = arith.constant 1 : index
    %172 = memref.load %arg4[%c3_78, %c1_79] : memref<8x4xf32, #tpu.memory_space<smem>>
    %173 = vector.broadcast %172 : f32 to vector<1x256xf32>
    %174 = arith.mulf %167, %173 : vector<1x256xf32>
    %175 = arith.addf %136, %174 : vector<1x256xf32>
    %c3_80 = arith.constant 3 : index
    %c2_81 = arith.constant 2 : index
    %176 = memref.load %arg4[%c3_80, %c2_81] : memref<8x4xf32, #tpu.memory_space<smem>>
    %177 = vector.broadcast %176 : f32 to vector<1x256xf32>
    %178 = arith.mulf %167, %177 : vector<1x256xf32>
    %179 = arith.addf %140, %178 : vector<1x256xf32>
    %c3_82 = arith.constant 3 : index
    %c3_83 = arith.constant 3 : index
    %180 = memref.load %arg4[%c3_82, %c3_83] : memref<8x4xf32, #tpu.memory_space<smem>>
    %181 = vector.broadcast %180 : f32 to vector<1x256xf32>
    %182 = arith.mulf %167, %181 : vector<1x256xf32>
    %183 = arith.addf %144, %182 : vector<1x256xf32>
    %c0_84 = arith.constant 0 : index
    %c4 = arith.constant 4 : index
    %184 = memref.load %arg2[%c0_84, %c4] : memref<4x8xf32, #tpu.memory_space<smem>>
    %185 = vector.broadcast %184 : f32 to vector<1x256xf32>
    %186 = arith.mulf %6, %185 : vector<1x256xf32>
    %c1_85 = arith.constant 1 : index
    %c4_86 = arith.constant 4 : index
    %187 = memref.load %arg2[%c1_85, %c4_86] : memref<4x8xf32, #tpu.memory_space<smem>>
    %188 = vector.broadcast %187 : f32 to vector<1x256xf32>
    %189 = arith.mulf %9, %188 : vector<1x256xf32>
    %190 = arith.addf %186, %189 : vector<1x256xf32>
    %c2_87 = arith.constant 2 : index
    %c4_88 = arith.constant 4 : index
    %191 = memref.load %arg2[%c2_87, %c4_88] : memref<4x8xf32, #tpu.memory_space<smem>>
    %192 = vector.broadcast %191 : f32 to vector<1x256xf32>
    %193 = arith.mulf %12, %192 : vector<1x256xf32>
    %194 = arith.addf %190, %193 : vector<1x256xf32>
    %c3_89 = arith.constant 3 : index
    %c4_90 = arith.constant 4 : index
    %195 = memref.load %arg2[%c3_89, %c4_90] : memref<4x8xf32, #tpu.memory_space<smem>>
    %196 = vector.broadcast %195 : f32 to vector<1x256xf32>
    %197 = arith.mulf %15, %196 : vector<1x256xf32>
    %198 = arith.addf %194, %197 : vector<1x256xf32>
    %c4_91 = arith.constant 4 : index
    %199 = memref.load %arg3[%c4_91] : memref<8xf32, #tpu.memory_space<smem>>
    %200 = vector.broadcast %199 : f32 to vector<1x256xf32>
    %201 = arith.addf %198, %200 : vector<1x256xf32>
    %cst_92 = arith.constant 0.000000e+00 : f32
    %202 = vector.broadcast %cst_92 : f32 to vector<1x256xf32>
    %203 = arith.cmpf ogt, %201, %202 : vector<1x256xf32>
    %cst_93 = arith.constant 2.000000e-01 : f32
    %204 = vector.broadcast %cst_93 : f32 to vector<1x256xf32>
    %205 = arith.mulf %201, %204 : vector<1x256xf32>
    %206 = arith.select %203, %201, %205 : vector<1x256xi1>, vector<1x256xf32>
    %c4_94 = arith.constant 4 : index
    %c0_95 = arith.constant 0 : index
    %207 = memref.load %arg4[%c4_94, %c0_95] : memref<8x4xf32, #tpu.memory_space<smem>>
    %208 = vector.broadcast %207 : f32 to vector<1x256xf32>
    %209 = arith.mulf %206, %208 : vector<1x256xf32>
    %210 = arith.addf %171, %209 : vector<1x256xf32>
    %c4_96 = arith.constant 4 : index
    %c1_97 = arith.constant 1 : index
    %211 = memref.load %arg4[%c4_96, %c1_97] : memref<8x4xf32, #tpu.memory_space<smem>>
    %212 = vector.broadcast %211 : f32 to vector<1x256xf32>
    %213 = arith.mulf %206, %212 : vector<1x256xf32>
    %214 = arith.addf %175, %213 : vector<1x256xf32>
    %c4_98 = arith.constant 4 : index
    %c2_99 = arith.constant 2 : index
    %215 = memref.load %arg4[%c4_98, %c2_99] : memref<8x4xf32, #tpu.memory_space<smem>>
    %216 = vector.broadcast %215 : f32 to vector<1x256xf32>
    %217 = arith.mulf %206, %216 : vector<1x256xf32>
    %218 = arith.addf %179, %217 : vector<1x256xf32>
    %c4_100 = arith.constant 4 : index
    %c3_101 = arith.constant 3 : index
    %219 = memref.load %arg4[%c4_100, %c3_101] : memref<8x4xf32, #tpu.memory_space<smem>>
    %220 = vector.broadcast %219 : f32 to vector<1x256xf32>
    %221 = arith.mulf %206, %220 : vector<1x256xf32>
    %222 = arith.addf %183, %221 : vector<1x256xf32>
    %c0_102 = arith.constant 0 : index
    %c5 = arith.constant 5 : index
    %223 = memref.load %arg2[%c0_102, %c5] : memref<4x8xf32, #tpu.memory_space<smem>>
    %224 = vector.broadcast %223 : f32 to vector<1x256xf32>
    %225 = arith.mulf %6, %224 : vector<1x256xf32>
    %c1_103 = arith.constant 1 : index
    %c5_104 = arith.constant 5 : index
    %226 = memref.load %arg2[%c1_103, %c5_104] : memref<4x8xf32, #tpu.memory_space<smem>>
    %227 = vector.broadcast %226 : f32 to vector<1x256xf32>
    %228 = arith.mulf %9, %227 : vector<1x256xf32>
    %229 = arith.addf %225, %228 : vector<1x256xf32>
    %c2_105 = arith.constant 2 : index
    %c5_106 = arith.constant 5 : index
    %230 = memref.load %arg2[%c2_105, %c5_106] : memref<4x8xf32, #tpu.memory_space<smem>>
    %231 = vector.broadcast %230 : f32 to vector<1x256xf32>
    %232 = arith.mulf %12, %231 : vector<1x256xf32>
    %233 = arith.addf %229, %232 : vector<1x256xf32>
    %c3_107 = arith.constant 3 : index
    %c5_108 = arith.constant 5 : index
    %234 = memref.load %arg2[%c3_107, %c5_108] : memref<4x8xf32, #tpu.memory_space<smem>>
    %235 = vector.broadcast %234 : f32 to vector<1x256xf32>
    %236 = arith.mulf %15, %235 : vector<1x256xf32>
    %237 = arith.addf %233, %236 : vector<1x256xf32>
    %c5_109 = arith.constant 5 : index
    %238 = memref.load %arg3[%c5_109] : memref<8xf32, #tpu.memory_space<smem>>
    %239 = vector.broadcast %238 : f32 to vector<1x256xf32>
    %240 = arith.addf %237, %239 : vector<1x256xf32>
    %cst_110 = arith.constant 0.000000e+00 : f32
    %241 = vector.broadcast %cst_110 : f32 to vector<1x256xf32>
    %242 = arith.cmpf ogt, %240, %241 : vector<1x256xf32>
    %cst_111 = arith.constant 2.000000e-01 : f32
    %243 = vector.broadcast %cst_111 : f32 to vector<1x256xf32>
    %244 = arith.mulf %240, %243 : vector<1x256xf32>
    %245 = arith.select %242, %240, %244 : vector<1x256xi1>, vector<1x256xf32>
    %c5_112 = arith.constant 5 : index
    %c0_113 = arith.constant 0 : index
    %246 = memref.load %arg4[%c5_112, %c0_113] : memref<8x4xf32, #tpu.memory_space<smem>>
    %247 = vector.broadcast %246 : f32 to vector<1x256xf32>
    %248 = arith.mulf %245, %247 : vector<1x256xf32>
    %249 = arith.addf %210, %248 : vector<1x256xf32>
    %c5_114 = arith.constant 5 : index
    %c1_115 = arith.constant 1 : index
    %250 = memref.load %arg4[%c5_114, %c1_115] : memref<8x4xf32, #tpu.memory_space<smem>>
    %251 = vector.broadcast %250 : f32 to vector<1x256xf32>
    %252 = arith.mulf %245, %251 : vector<1x256xf32>
    %253 = arith.addf %214, %252 : vector<1x256xf32>
    %c5_116 = arith.constant 5 : index
    %c2_117 = arith.constant 2 : index
    %254 = memref.load %arg4[%c5_116, %c2_117] : memref<8x4xf32, #tpu.memory_space<smem>>
    %255 = vector.broadcast %254 : f32 to vector<1x256xf32>
    %256 = arith.mulf %245, %255 : vector<1x256xf32>
    %257 = arith.addf %218, %256 : vector<1x256xf32>
    %c5_118 = arith.constant 5 : index
    %c3_119 = arith.constant 3 : index
    %258 = memref.load %arg4[%c5_118, %c3_119] : memref<8x4xf32, #tpu.memory_space<smem>>
    %259 = vector.broadcast %258 : f32 to vector<1x256xf32>
    %260 = arith.mulf %245, %259 : vector<1x256xf32>
    %261 = arith.addf %222, %260 : vector<1x256xf32>
    %c0_120 = arith.constant 0 : index
    %c6 = arith.constant 6 : index
    %262 = memref.load %arg2[%c0_120, %c6] : memref<4x8xf32, #tpu.memory_space<smem>>
    %263 = vector.broadcast %262 : f32 to vector<1x256xf32>
    %264 = arith.mulf %6, %263 : vector<1x256xf32>
    %c1_121 = arith.constant 1 : index
    %c6_122 = arith.constant 6 : index
    %265 = memref.load %arg2[%c1_121, %c6_122] : memref<4x8xf32, #tpu.memory_space<smem>>
    %266 = vector.broadcast %265 : f32 to vector<1x256xf32>
    %267 = arith.mulf %9, %266 : vector<1x256xf32>
    %268 = arith.addf %264, %267 : vector<1x256xf32>
    %c2_123 = arith.constant 2 : index
    %c6_124 = arith.constant 6 : index
    %269 = memref.load %arg2[%c2_123, %c6_124] : memref<4x8xf32, #tpu.memory_space<smem>>
    %270 = vector.broadcast %269 : f32 to vector<1x256xf32>
    %271 = arith.mulf %12, %270 : vector<1x256xf32>
    %272 = arith.addf %268, %271 : vector<1x256xf32>
    %c3_125 = arith.constant 3 : index
    %c6_126 = arith.constant 6 : index
    %273 = memref.load %arg2[%c3_125, %c6_126] : memref<4x8xf32, #tpu.memory_space<smem>>
    %274 = vector.broadcast %273 : f32 to vector<1x256xf32>
    %275 = arith.mulf %15, %274 : vector<1x256xf32>
    %276 = arith.addf %272, %275 : vector<1x256xf32>
    %c6_127 = arith.constant 6 : index
    %277 = memref.load %arg3[%c6_127] : memref<8xf32, #tpu.memory_space<smem>>
    %278 = vector.broadcast %277 : f32 to vector<1x256xf32>
    %279 = arith.addf %276, %278 : vector<1x256xf32>
    %cst_128 = arith.constant 0.000000e+00 : f32
    %280 = vector.broadcast %cst_128 : f32 to vector<1x256xf32>
    %281 = arith.cmpf ogt, %279, %280 : vector<1x256xf32>
    %cst_129 = arith.constant 2.000000e-01 : f32
    %282 = vector.broadcast %cst_129 : f32 to vector<1x256xf32>
    %283 = arith.mulf %279, %282 : vector<1x256xf32>
    %284 = arith.select %281, %279, %283 : vector<1x256xi1>, vector<1x256xf32>
    %c6_130 = arith.constant 6 : index
    %c0_131 = arith.constant 0 : index
    %285 = memref.load %arg4[%c6_130, %c0_131] : memref<8x4xf32, #tpu.memory_space<smem>>
    %286 = vector.broadcast %285 : f32 to vector<1x256xf32>
    %287 = arith.mulf %284, %286 : vector<1x256xf32>
    %288 = arith.addf %249, %287 : vector<1x256xf32>
    %c6_132 = arith.constant 6 : index
    %c1_133 = arith.constant 1 : index
    %289 = memref.load %arg4[%c6_132, %c1_133] : memref<8x4xf32, #tpu.memory_space<smem>>
    %290 = vector.broadcast %289 : f32 to vector<1x256xf32>
    %291 = arith.mulf %284, %290 : vector<1x256xf32>
    %292 = arith.addf %253, %291 : vector<1x256xf32>
    %c6_134 = arith.constant 6 : index
    %c2_135 = arith.constant 2 : index
    %293 = memref.load %arg4[%c6_134, %c2_135] : memref<8x4xf32, #tpu.memory_space<smem>>
    %294 = vector.broadcast %293 : f32 to vector<1x256xf32>
    %295 = arith.mulf %284, %294 : vector<1x256xf32>
    %296 = arith.addf %257, %295 : vector<1x256xf32>
    %c6_136 = arith.constant 6 : index
    %c3_137 = arith.constant 3 : index
    %297 = memref.load %arg4[%c6_136, %c3_137] : memref<8x4xf32, #tpu.memory_space<smem>>
    %298 = vector.broadcast %297 : f32 to vector<1x256xf32>
    %299 = arith.mulf %284, %298 : vector<1x256xf32>
    %300 = arith.addf %261, %299 : vector<1x256xf32>
    %c0_138 = arith.constant 0 : index
    %c7 = arith.constant 7 : index
    %301 = memref.load %arg2[%c0_138, %c7] : memref<4x8xf32, #tpu.memory_space<smem>>
    %302 = vector.broadcast %301 : f32 to vector<1x256xf32>
    %303 = arith.mulf %6, %302 : vector<1x256xf32>
    %c1_139 = arith.constant 1 : index
    %c7_140 = arith.constant 7 : index
    %304 = memref.load %arg2[%c1_139, %c7_140] : memref<4x8xf32, #tpu.memory_space<smem>>
    %305 = vector.broadcast %304 : f32 to vector<1x256xf32>
    %306 = arith.mulf %9, %305 : vector<1x256xf32>
    %307 = arith.addf %303, %306 : vector<1x256xf32>
    %c2_141 = arith.constant 2 : index
    %c7_142 = arith.constant 7 : index
    %308 = memref.load %arg2[%c2_141, %c7_142] : memref<4x8xf32, #tpu.memory_space<smem>>
    %309 = vector.broadcast %308 : f32 to vector<1x256xf32>
    %310 = arith.mulf %12, %309 : vector<1x256xf32>
    %311 = arith.addf %307, %310 : vector<1x256xf32>
    %c3_143 = arith.constant 3 : index
    %c7_144 = arith.constant 7 : index
    %312 = memref.load %arg2[%c3_143, %c7_144] : memref<4x8xf32, #tpu.memory_space<smem>>
    %313 = vector.broadcast %312 : f32 to vector<1x256xf32>
    %314 = arith.mulf %15, %313 : vector<1x256xf32>
    %315 = arith.addf %311, %314 : vector<1x256xf32>
    %c7_145 = arith.constant 7 : index
    %316 = memref.load %arg3[%c7_145] : memref<8xf32, #tpu.memory_space<smem>>
    %317 = vector.broadcast %316 : f32 to vector<1x256xf32>
    %318 = arith.addf %315, %317 : vector<1x256xf32>
    %cst_146 = arith.constant 0.000000e+00 : f32
    %319 = vector.broadcast %cst_146 : f32 to vector<1x256xf32>
    %320 = arith.cmpf ogt, %318, %319 : vector<1x256xf32>
    %cst_147 = arith.constant 2.000000e-01 : f32
    %321 = vector.broadcast %cst_147 : f32 to vector<1x256xf32>
    %322 = arith.mulf %318, %321 : vector<1x256xf32>
    %323 = arith.select %320, %318, %322 : vector<1x256xi1>, vector<1x256xf32>
    %c7_148 = arith.constant 7 : index
    %c0_149 = arith.constant 0 : index
    %324 = memref.load %arg4[%c7_148, %c0_149] : memref<8x4xf32, #tpu.memory_space<smem>>
    %325 = vector.broadcast %324 : f32 to vector<1x256xf32>
    %326 = arith.mulf %323, %325 : vector<1x256xf32>
    %327 = arith.addf %288, %326 : vector<1x256xf32>
    %c7_150 = arith.constant 7 : index
    %c1_151 = arith.constant 1 : index
    %328 = memref.load %arg4[%c7_150, %c1_151] : memref<8x4xf32, #tpu.memory_space<smem>>
    %329 = vector.broadcast %328 : f32 to vector<1x256xf32>
    %330 = arith.mulf %323, %329 : vector<1x256xf32>
    %331 = arith.addf %292, %330 : vector<1x256xf32>
    %c7_152 = arith.constant 7 : index
    %c2_153 = arith.constant 2 : index
    %332 = memref.load %arg4[%c7_152, %c2_153] : memref<8x4xf32, #tpu.memory_space<smem>>
    %333 = vector.broadcast %332 : f32 to vector<1x256xf32>
    %334 = arith.mulf %323, %333 : vector<1x256xf32>
    %335 = arith.addf %296, %334 : vector<1x256xf32>
    %c7_154 = arith.constant 7 : index
    %c3_155 = arith.constant 3 : index
    %336 = memref.load %arg4[%c7_154, %c3_155] : memref<8x4xf32, #tpu.memory_space<smem>>
    %337 = vector.broadcast %336 : f32 to vector<1x256xf32>
    %338 = arith.mulf %323, %337 : vector<1x256xf32>
    %339 = arith.addf %300, %338 : vector<1x256xf32>
    %c0_156 = arith.constant 0 : index
    %c0_157 = arith.constant 0 : index
    %340 = arith.index_cast %3 : i32 to index
    %341 = vector.load %arg7[%c0_156, %c0_157, %340] : memref<1x4x256xf32, #tpu.memory_space<vmem>>, vector<1x1x256xf32>
    %342 = vector.shape_cast %341 : vector<1x1x256xf32> to vector<1x256xf32>
    %343 = vector.shape_cast %327 : vector<1x256xf32> to vector<1x1x256xf32>
    tpu.vector_store %arg7[%c0_156, %c0_157, %340], %343 {strides = array<i32>} : memref<1x4x256xf32, #tpu.memory_space<vmem>>, vector<1x1x256xf32>,
    %c0_158 = arith.constant 0 : index
    %c1_159 = arith.constant 1 : index
    %344 = arith.index_cast %3 : i32 to index
    %345 = vector.load %arg7[%c0_158, %c1_159, %344] : memref<1x4x256xf32, #tpu.memory_space<vmem>>, vector<1x1x256xf32>
    %346 = vector.shape_cast %345 : vector<1x1x256xf32> to vector<1x256xf32>
    %347 = vector.shape_cast %331 : vector<1x256xf32> to vector<1x1x256xf32>
    tpu.vector_store %arg7[%c0_158, %c1_159, %344], %347 {strides = array<i32>} : memref<1x4x256xf32, #tpu.memory_space<vmem>>, vector<1x1x256xf32>,
    %c0_160 = arith.constant 0 : index
    %c2_161 = arith.constant 2 : index
    %348 = arith.index_cast %3 : i32 to index
    %349 = vector.load %arg7[%c0_160, %c2_161, %348] : memref<1x4x256xf32, #tpu.memory_space<vmem>>, vector<1x1x256xf32>
    %350 = vector.shape_cast %349 : vector<1x1x256xf32> to vector<1x256xf32>
    %351 = vector.shape_cast %335 : vector<1x256xf32> to vector<1x1x256xf32>
    tpu.vector_store %arg7[%c0_160, %c2_161, %348], %351 {strides = array<i32>} : memref<1x4x256xf32, #tpu.memory_space<vmem>>, vector<1x1x256xf32>,
    %c0_162 = arith.constant 0 : index
    %c3_163 = arith.constant 3 : index
    %352 = arith.index_cast %3 : i32 to index
    %353 = vector.load %arg7[%c0_162, %c3_163, %352] : memref<1x4x256xf32, #tpu.memory_space<vmem>>, vector<1x1x256xf32>
    %354 = vector.shape_cast %353 : vector<1x1x256xf32> to vector<1x256xf32>
    %355 = vector.shape_cast %339 : vector<1x256xf32> to vector<1x1x256xf32>
    tpu.vector_store %arg7[%c0_162, %c3_163, %352], %355 {strides = array<i32>} : memref<1x4x256xf32, #tpu.memory_space<vmem>>, vector<1x1x256xf32>,
    %c1_i32_164 = arith.constant 1 : i32
    return
  }
  func.func @transform_0(%arg0: i32, %arg1: i32) -> (i32, i32) {
    %c0_i32 = arith.constant 0 : i32
    %c0_i32_0 = arith.constant 0 : i32
    %c0_i32_1 = arith.constant 0 : i32
    return %c0_i32, %c0_i32_0 : i32, i32
  }
  func.func @transform_1(%arg0: i32, %arg1: i32) -> i32 {
    %c0_i32 = arith.constant 0 : i32
    %c0_i32_0 = arith.constant 0 : i32
    return %c0_i32 : i32
  }
  func.func @transform_2(%arg0: i32, %arg1: i32) -> (i32, i32) {
    %c0_i32 = arith.constant 0 : i32
    %c0_i32_0 = arith.constant 0 : i32
    %c0_i32_1 = arith.constant 0 : i32
    return %c0_i32, %c0_i32_0 : i32, i32
  }
  func.func @transform_3(%arg0: i32, %arg1: i32) -> i32 {
    %c0_i32 = arith.constant 0 : i32
    %c0_i32_0 = arith.constant 0 : i32
    return %c0_i32 : i32
  }
  func.func @transform_4(%arg0: i32, %arg1: i32) -> (i32, i32, i32) {
    %c0_i32 = arith.constant 0 : i32
    %c0_i32_0 = arith.constant 0 : i32
    return %arg0, %c0_i32, %arg1 : i32, i32, i32
  }
  func.func @transform_5(%arg0: i32, %arg1: i32) -> (i32, i32, i32) {
    %c0_i32 = arith.constant 0 : i32
    %c0_i32_0 = arith.constant 0 : i32
    return %arg0, %c0_i32, %arg1 : i32, i32, i32
  }
}

</mosaic_0001>

<bundles_post_ra>
// kernel: tpu_custom_call.1
= control target key start
LH: loop header
LB: loop body
LE: loop exit
PB: predicated region body
PF: predicated region fallthrough
CT: control target
= control target key end

     0   :  { %s1550_s0 = inlined_call_operand.hbm [shape: f32[4,8], index: 0, kind: input, shape index: {}]   ;;  %s1551_s1 = inlined_call_operand.vmem [shape: f32[8], index: 1, kind: input, shape index: {}]   ;;  %s1552_s2 = inlined_call_operand.vmem [shape: f32[8,4], index: 2, kind: input, shape index: {}]   ;;  %s1553_s3 = inlined_call_operand.vmem [shape: f32[4], index: 3, kind: input, shape index: {}]   ;;  %s1554_s4 = inlined_call_operand.vmem [shape: f32[2,4,256], index: 4, kind: input, shape index: {}]   ;;  %s1555_s5 = inlined_call_operand.hbm [shape: f32[2,4,256], index: 5, kind: output, shape index: {}]  }
   0x1   :  { %1559 = sst [smem:[#allocation19_spill]] %s1550_s0 }
   0x2   :  { %1560 = sst [smem:[#allocation20_spill]] %s1551_s1 }
   0x3   :  { %1561 = sst [smem:[#allocation21_spill]] %s1552_s2 }
   0x4   :  { %1562 = sst [smem:[#allocation22_spill]] %s1553_s3 }
   0x5   :  { %1563 = sst [smem:[#allocation23_spill]] %s1554_s4 }
   0x6   :  { %10 = vsyncpa [#allocation4], 0 }
   0x7   :  { %11 = vsyncpa [#allocation5], 0 }
   0x8   :  { %12 = vsyncpa [#allocation8], 0 }
   0x9   :  { %13 = vsyncpa [#allocation3], 0 }
   0xa   :  { %15 = vsyncpa [#allocation3 + $0x1], 0  ;;  %s1144_s18 = smov 0   ;;  %s1146_s19 = smov 0  }
   0xb   :  { %s1148_s20 = smov 0   ;;  %s1150_s21 = smov 0  }
   0xc   :  { %s1152_s22 = smov 0   ;;  %s1154_s23 = smov 0  }
   0xd LB: > { %1564 = sst [smem:[#allocation15_spill]] %s1095_s20  ;;  %s766_s24 = sadd.s32 4294967295, %s1107_s23   ;;  %s1107_s23 = sphi %s1154_s23, %s21_s23   ;;  %s1103_s22 = sphi %s1152_s22, %s1582_s22   ;;  %s1099_s21 = sphi %s1150_s21, %s1581_s21   ;;  %s1095_s20 = sphi %s1148_s20, %s1580_s20   ;;  %s1091_s19 = sphi %s1146_s19, %s1584_s19   ;;  %s1087_s18 = sphi %s1144_s18, %s1583_s18  }
   0xe   : > { %1565 = sst [smem:[#allocation16_spill]] %s1103_s22  ;;  %s767_s25 = sadd.s32 4294967294, %s1107_s23  }
   0xf   : > { %s33_s26 = sadd.s32 1, %s1103_s22  ;;  %s154_s27 = sadd.s32 1, %s1095_s20 }
  0x10   : > { %p35_p0 = scmp.ge.s32.totalorder %s33_s26, 2  ;;  %p164_p1 = scmp.ne.s32.totalorder %s1095_s20, %s1091_s19 }
  0x11   : > { %p165_p2 = scmp.eq.s32.totalorder %s766_s24, 1  ;;  %p170_p3 = scmp.ne.s32.totalorder %s1091_s19, %s1087_s18 }
  0x12   : > { %s1586_s26 = smov (%p35_p0, %s33_s26), 0  ;;  %p171_p5 = scmp.eq.s32.totalorder %s767_s25, 1 }
  0x13   : > { %1566 = sst [smem:[#allocation17_spill]] %s1586_s26  ;;  %p1184_p4 = por %p165_p2, %p164_p1 }
  0x14   : > { %s149_s29 = ssub.s32 %s1103_s22, %s1586_s26  ;;  %p768_p6 = scmp.ge.s32.totalorder %s1107_s23, 1 }
  0x15   : > { %p152_p7 = scmp.eq.s32.totalorder %s149_s29, 0  ;;  %p1191_p8 = por %p171_p5, %p170_p3 }
  0x16   : > { %p178_p9 = scmp.lt.s32.totalorder %s1107_s23, 3  ;;  %p1203_p11 = scmp.eq.s32.totalorder %s766_s24, 0 }
  0x17   : > { %s1568_s30 = scalar_select %p1191_p8, 1, 0 }
  0x18   : > { %s1197_s6 = scalar_select %p152_p7, %s1095_s20, %s154_s27  }
  0x19   : > { %p1199_p10 = pnand %p768_p6, %p178_p9  ;;  %s1572_s2 = sld [smem:[#allocation21_spill]] }
  0x1a   : > { %1569 = sst [smem:[#allocation18_spill]] %s1197_s6 }
  0x1b   : > { %p885_p12 = pneg %p1199_p10  ;;  %s1574_s1 = sld [smem:[#allocation20_spill]] }
  0x1d   : > { %p1214_p13 = pnand %p1203_p11, %p885_p12 }
  0x1f   : > { %s211_s11 = sshll.u32 %s1572_s2, 4  ;;  %p965_p1 = pneg %p1214_p13  ;;  %s212_s11 = int_to_ptr.vmem [resolvable:$true] %s211_s11 }
  0x20   : > { %s963_s16 = scalar_lea.vmem %s212_s11, 128  ;;  %p971_p5 = scmp.lt.s32.totalorder %s212_s11, %s212_s11 }
  0x21   : > { %s200_s15 = sshll.u32 %s1574_s1, 4  ;;  %p964_p0 = scmp.ne.s32.totalorder %s212_s11, %s963_s16  ;;  %s201_s15 = int_to_ptr.vmem [resolvable:$true] %s200_s15 }
  0x22   : > { %p972_p6 = scmp.lt.s32.totalorder %s963_s16, %s963_s16 }
  0x23   : > { %p966_p2 = pnand %p965_p1, %p964_p0 }
  0x24   : > { %p973_p7 = por %p972_p6, %p971_p5 }
  0x25   : > { %p967_p3 = pneg %p966_p2 }
  0x27   : > { %p974_p9 = pnand %p973_p7, %p967_p3 }
  0x29   : > { %977 = shalt.err (!%p974_p9)
}
  0x2a   : > { %s1109_s17 = smov [#allocation7]   ;;  %s1110_s24 = smov [#allocation2]  }
  0x2b   : > { %894 = dma.vmem_to_smem (!%p1214_p13), %s212_s11, 128, %s1109_s17, [#allocation8]  }
  0x2c   : > { %s1575_s0 = sld [smem:[#allocation19_spill]]  ;;  %s989_s29 = scalar_lea.vmem %s201_s15, 16 }
  0x2d   : > { %p990_p12 = scmp.ne.s32.totalorder %s201_s15, %s989_s29  ;;  %p997_p3 = scmp.lt.s32.totalorder %s201_s15, %s201_s15 }
  0x2e   : > { %p998_p5 = scmp.lt.s32.totalorder %s989_s29, %s989_s29 }
  0x2f   : > { %p992_p0 = pnand %p990_p12, %p965_p1 }
  0x30   : > { %p999_p6 = por %p998_p5, %p997_p3 }
  0x31   : > { %p993_p2 = pneg %p992_p0 }
  0x32   : > { %888 = dma.hbm_to_smem (!%p1214_p13), %s1575_s0, 64, %s1110_s24, [#allocation4]  }
  0x33   : > { %p1000_p7 = pnand %p999_p6, %p993_p2 }
  0x35   : > { %1003 = shalt.err (!%p1000_p7)
}
  0x36   : > { %s1111_s9 = smov [#allocation6]   ;;  %s1576_s3 = sld [smem:[#allocation22_spill]] }
  0x37   : > { %891 = dma.vmem_to_smem (!%p1214_p13), %s201_s15, 16, %s1111_s9, [#allocation5]  }
  0x3c   : > { %s222_s13 = sshll.u32 %s1576_s3, 4  ;;  %s223_s13 = int_to_ptr.vmem [resolvable:$true] %s222_s13 }
  0x3d   : > { %s1004_s14 = scalar_lea.vmem %s223_s13, 16  ;;  %p1012_p8 = scmp.lt.s32.totalorder %s223_s13, %s223_s13 }
  0x3e   : > { %p1005_p9 = scmp.ne.s32.totalorder %s223_s13, %s1004_s14  ;;  %p1013_p3 = scmp.lt.s32.totalorder %s1004_s14, %s1004_s14 }
  0x40   : > { %p1007_p12 = pnand %p1005_p9, %p965_p1  ;;  %p1014_p2 = por %p1013_p3, %p1012_p8 }
  0x42   : > { %p1008_p0 = pneg %p1007_p12 }
  0x44   : > { %p1015_p5 = pnand %p1014_p2, %p1008_p0 }
  0x46   : > { %1018 = shalt.err (!%p1015_p5)
}
  0x47   : > { %s1112_s16 = smov [#allocation9]   ;;  %248 = sbr.rel (%p1199_p10) target bundleno = 190 (0xbe), region = 40 }
  0x48   : > { %897 = dma.vmem_to_smem (!%p1214_p13), %s223_s13, 16, %s1112_s16, [#allocation8]  }
  0x4c   : > { %1070 = dma.done.wait (%p1203_p11), [#allocation4], 64  }
  0x4d   : > { %1072 = vsyncadd (%p1203_p11), [#allocation4], 4294967232 }
  0x4e   : > { %1074 = dma.done.wait (%p1203_p11), [#allocation5], 16  }
  0x4f   : > { %1076 = vsyncadd (%p1203_p11), [#allocation5], 4294967280 }
  0x50   : > { %1078 = dma.done.wait (%p1203_p11), [#allocation8], 144  }
  0x51   : > { %1080 = vsyncadd (%p1203_p11), [#allocation8], 4294967152 }
  0x52   : > { %266 = sfence }
  0x53   : > { %p294_p8 = scmp.lt.s32.totalorder %s1099_s21, 1  ;;  %s1261_s7 = sld [smem:[#allocation9]] }
  0x54   : > { %s1264_s15 = sld [smem:[#allocation9 + $0x1]] }
  0x55   : > { %s295_s12 = scalar_select %p294_p8, %s1099_s21, 1 }
  0x56   : > { %s323_s17 = sld [smem:[#allocation2]] }
  0x57   : > { %s788_s24 = sld [smem:[#allocation2 + $0x80]]  ;;  %s865_s25 = sshll.u32 %s295_s12, 3 }
  0x58   : > { %s1266_s27 = sld [smem:[#allocation9 + $0x2]] }
  0x59   : > { %s1268_s29 = sld [smem:[#allocation9 + $0x3]]  ;;  %v312_v35 = vstv %s1261_s7 }
  0x5a   : > { %s789_s9 = sld [smem:[#allocation2 + $0x100]]  ;;  %v315_v42 = vstv %s1264_s15 }
  0x5b   : > { %s1577_s4 = sld [smem:[#allocation23_spill]] }
  0x5c   : > { %s790_s13 = sld [smem:[#allocation2 + $0x180]]  ;;  %v324_v2 = vstv %s323_s17 }
  0x5d   : > { %s1273_s14 = sld [smem:[#allocation6]]  ;;  %v327_v3 = vstv %s788_s24 }
  0x5e   : > { %s1275_s16 = sld [smem:[#allocation7]]  ;;  %v318_v45 = vstv %s1266_s27 }
  0x5f   : > { %s1279_s0 = sld [smem:[#allocation7 + $0x1]]  ;;  %v321_v54 = vstv %s1268_s29 }
  0x60   : > { %s794_s12 = sld [smem:[#allocation2 + $0x1]]  ;;  %v331_v7 = vstv %s789_s9 }
  0x61   : > { %s301_s11 = scalar_lea.vmem %s1577_s4, %s865_s25  ;;  %s795_s1 = sld [smem:[#allocation2 + $0x81]] }
  0x62   : > { %v1277_v0 = vld [vmem:[%s301_s11] ss:$4 sm:$0x3]  ;;  %v1281_v1 = vld [vmem:[%s301_s11 + $0x1] ss:$4 sm:$0x3]  ;;  %v335_v11 = vstv %s790_s13 }
  0x63   : > { %s1283_s2 = sld [smem:[#allocation7 + $0x2]]  ;;  %v325_v4 = vmul.f32 %v324_v2, %v1277_v0  ;;  %v328_v5 = vmul.f32 %v1281_v1, %v327_v3  ;;  %v1289_v6 = vld [vmem:[%s301_s11 + $0x2] ss:$4 sm:$0x3]  ;;  %v339_v23 = vstv %s1273_s14  ;;  %v313_v41 = vadd.f32 %v312_v35, %v1277_v0 }
  0x64   : > { %s1287_s25 = sld [smem:[#allocation7 + $0x3]]  ;;  %v332_v9 = vmul.f32 %v1289_v6, %v331_v7  ;;  %v1298_v10 = vld [vmem:[%s301_s11 + $0x3] ss:$4 sm:$0x3]  ;;  %v345_v50 = vstv %s1275_s16  ;;  %v316_v53 = vadd.f32 %v1281_v1, %v315_v42  ;;  %v319_v61 = vadd.f32 %v1289_v6, %v318_v45 }
  0x65   : > { %s796_s10 = sld [smem:[#allocation2 + $0x101]]  ;;  %v329_v8 = vadd.f32 %v328_v5, %v325_v4  ;;  %v336_v15 = vmul.f32 %v1298_v10, %v335_v11  ;;  %v349_v51 = vstv %s1279_s0  ;;  %v322_v3 = vadd.f32 %v1298_v10, %v321_v54 }
  0x66   : > { %s1291_s8 = sld [smem:[#allocation2 + $0x181]]  ;;  %v361_v12 = vstv %s794_s12 }
  0x67   : > { %s1293_s3 = sld [smem:[#allocation6 + $0x1]]  ;;  %v364_v13 = vstv %s795_s1  ;;  %v333_v14 = vadd.f32 %v332_v9, %v329_v8  ;;  %v362_v16 = vmul.f32 %v361_v12, %v1277_v0 }
  0x68   : > { %s1296_s17 = sld [smem:[#allocation7 + $0x80]]  ;;  %v365_v17 = vmul.f32 %v1281_v1, %v364_v13 }
  0x69   : > { %s1300_s24 = sld [smem:[#allocation7 + $0x81]]  ;;  %v337_v19 = vadd.f32 %v336_v15, %v333_v14  ;;  %v353_v55 = vstv %s1283_s2 }
  0x6a   : > { %s803_s4 = sld [smem:[#allocation2 + $0x2]]  ;;  %v366_v20 = vadd.f32 %v365_v17, %v362_v16  ;;  %v357_v57 = vstv %s1287_s25 }
  0x6b   : > { %s804_s9 = sld [smem:[#allocation2 + $0x82]]  ;;  %v368_v18 = vstv %s796_s10  ;;  %v340_v29 = vadd.f32 %v339_v23, %v337_v19 }
  0x6c   : > { %s805_s26 = sld [smem:[#allocation2 + $0x102]]  ;;  %v369_v21 = vmul.f32 %v1289_v6, %v368_v18  ;;  %v372_v24 = vstv %s1291_s8 }
  0x6d   : > { %s1305_s11 = sld [smem:[#allocation7 + $0x82]]  ;;  %v373_v31 = vmul.f32 %v1298_v10, %v372_v24  ;;  %v342_v36 = vmul.f32 0.2, %v340_v29  ;;  %vm341_vm0 = vcmp.gt.f32.partialorder %v340_v29, 0.0  ;;  %v376_v38 = vstv %s1293_s3 }
  0x6e   : > { %s1307_s13 = sld [smem:[#allocation2 + $0x182]]  ;;  %v370_v30 = vadd.f32 %v369_v21, %v366_v20  ;;  %v382_v7 = vstv %s1296_s17 }
  0x6f   : > { %s1309_s1 = sld [smem:[#allocation7 + $0x83]]  ;;  %v343_v49 = vsel %vm341_vm0, %v340_v29, %v342_v36  ;;  %v386_v9 = vstv %s1300_s24 }
  0x70   : > { %v398_v22 = vstv %s803_s4  ;;  %s1312_s12 = sld [smem:[#allocation6 + $0x2]]  ;;  %v374_v37 = vadd.f32 %v373_v31, %v370_v30  ;;  %v346_v62 = vmul.f32 %v345_v50, %v343_v49  ;;  %v350_v63 = vmul.f32 %v349_v51, %v343_v49 }
  0x71   : > { %v399_v25 = vmul.f32 %v398_v22, %v1277_v0  ;;  %v401_v26 = vstv %s804_s9  ;;  %s1317_s10 = sld [smem:[#allocation7 + $0x100]]  ;;  %v354_v4 = vmul.f32 %v353_v55, %v343_v49  ;;  %v358_v8 = vmul.f32 %v357_v57, %v343_v49 }
  0x72   : > { %v402_v27 = vmul.f32 %v1281_v1, %v401_v26  ;;  %v405_v28 = vstv %s805_s26  ;;  %s1320_s22 = sld [smem:[#allocation7 + $0x101]]  ;;  %v377_v52 = vadd.f32 %v376_v38, %v374_v37  ;;  %v347_v16 = vadd.f32 %v346_v62, %v313_v41 }
  0x73   : > { %s812_s6 = sld [smem:[#allocation2 + $0x3]]  ;;  %v406_v33 = vmul.f32 %v1289_v6, %v405_v28  ;;  %v390_v12 = vstv %s1305_s11  ;;  %v351_v17 = vadd.f32 %v350_v63, %v316_v53  ;;  %v355_v20 = vadd.f32 %v354_v4, %v319_v61 }
  0x74   : > { %s813_s4 = sld [smem:[#allocation2 + $0x83]]  ;;  %v403_v32 = vadd.f32 %v402_v27, %v399_v25  ;;  %v409_v34 = vstv %s1307_s13  ;;  %v379_v5 = vmul.f32 0.2, %v377_v52  ;;  %vm378_vm1 = vcmp.gt.f32.partialorder %v377_v52, 0.0 }
  0x75   : > { %s1324_s14 = sld [smem:[#allocation2 + $0x103]]  ;;  %v410_v40 = vmul.f32 %v1298_v10, %v409_v34  ;;  %v394_v24 = vstv %s1309_s1  ;;  %v359_v35 = vadd.f32 %v358_v8, %v322_v3 }
  0x76   : > { %s1327_s8 = sld [smem:[#allocation7 + $0x102]]  ;;  %v407_v39 = vadd.f32 %v406_v33, %v403_v32  ;;  %v413_v58 = vstv %s1312_s12  ;;  %v380_v21 = vsel %vm378_vm1, %v377_v52, %v379_v5 }
  0x77   : > { %s1330_s26 = sld [smem:[#allocation2 + $0x183]]  ;;  %v383_v31 = vmul.f32 %v382_v7, %v380_v21  ;;  %v387_v32 = vmul.f32 %v386_v9, %v380_v21  ;;  %v391_v33 = vmul.f32 %v390_v12, %v380_v21  ;;  %v395_v37 = vmul.f32 %v394_v24, %v380_v21 }
  0x78   : > { %s1332_s9 = sld [smem:[#allocation7 + $0x103]]  ;;  %v411_v56 = vadd.f32 %v410_v40, %v407_v39  ;;  %v419_v39 = vstv %s1317_s10  ;;  %v423_v40 = vstv %s1320_s22 }
  0x79   : > { %s1336_s20 = sld [smem:[#allocation6 + $0x3]]  ;;  %v435_v43 = vstv %s812_s6  ;;  %v384_v45 = vadd.f32 %v383_v31, %v347_v16  ;;  %v396_v61 = vadd.f32 %v395_v37, %v359_v35 }
  0x7a   : > { %v438_v44 = vstv %s813_s4  ;;  %s1340_s7 = sld [smem:[#allocation7 + $0x180]]  ;;  %v436_v46 = vmul.f32 %v435_v43, %v1277_v0  ;;  %v414_v11 = vadd.f32 %v413_v58, %v411_v56 }
  0x7b   : > { %v439_v47 = vmul.f32 %v1281_v1, %v438_v44  ;;  %v442_v48 = vstv %s1324_s14  ;;  %s1346_s3 = sld [smem:[#allocation7 + $0x181]] }
  0x7c   : > { %s1350_s15 = sld [smem:[#allocation2 + $0x4]]  ;;  %v443_v60 = vmul.f32 %v1289_v6, %v442_v48  ;;  %v416_v25 = vmul.f32 0.2, %v414_v11  ;;  %vm415_vm2 = vcmp.gt.f32.partialorder %v414_v11, 0.0  ;;  %v427_v41 = vstv %s1327_s8 }
  0x7d   : > { %s1355_s6 = sld [smem:[#allocation2 + $0x84]]  ;;  %v440_v59 = vadd.f32 %v439_v47, %v436_v46  ;;  %v446_v2 = vstv %s1330_s26  ;;  %v388_v46 = vadd.f32 %v387_v32, %v351_v17  ;;  %v392_v47 = vadd.f32 %v391_v33, %v355_v20 }
  0x7e   : > { %s1360_s27 = sld [smem:[#allocation2 + $0x104]]  ;;  %v447_v14 = vmul.f32 %v1298_v10, %v446_v2  ;;  %v417_v38 = vsel %vm415_vm2, %v414_v11, %v416_v25  ;;  %v431_v42 = vstv %s1332_s9 }
  0x7f   : > { %s1364_s0 = sld [smem:[#allocation2 + $0x184]]  ;;  %v444_v13 = vadd.f32 %v443_v60, %v440_v59  ;;  %v450_v34 = vstv %s1336_s20  ;;  %v420_v49 = vmul.f32 %v419_v39, %v417_v38  ;;  %v424_v50 = vmul.f32 %v423_v40, %v417_v38 }
  0x80   : > { %s1368_s2 = sld [smem:[#allocation7 + $0x182]]  ;;  %v428_v53 = vmul.f32 %v427_v41, %v417_v38  ;;  %v432_v62 = vmul.f32 %v431_v42, %v417_v38  ;;  %v456_v2 = vstv %s1340_s7 }
  0x81   : > { %s1371_s29 = sld [smem:[#allocation7 + $0x183]]  ;;  %v448_v28 = vadd.f32 %v447_v14, %v444_v13  ;;  %v421_v4 = vadd.f32 %v420_v49, %v384_v45  ;;  %v425_v5 = vadd.f32 %v424_v50, %v388_v46  ;;  %v460_v7 = vstv %s1346_s3 }
  0x82   : > { %v472_v15 = vstv %s1350_s15  ;;  %s1376_s16 = sld [smem:[#allocation6 + $0x4]]  ;;  %v429_v9 = vadd.f32 %v428_v53, %v392_v47  ;;  %v433_v14 = vadd.f32 %v432_v62, %v396_v61 }
  0x83   : > { %v473_v18 = vmul.f32 %v472_v15, %v1277_v0  ;;  %v475_v19 = vstv %s1355_s6  ;;  %s1380_s25 = sld [smem:[#allocation7 + $0x200]]  ;;  %v451_v43 = vadd.f32 %v450_v34, %v448_v28 }
  0x84   : > { %v476_v22 = vmul.f32 %v1281_v1, %v475_v19  ;;  %v479_v23 = vstv %s1360_s27  ;;  %s1384_s17 = sld [smem:[#allocation7 + $0x201]] }
  0x85   : > { %v480_v26 = vmul.f32 %v1289_v6, %v479_v23  ;;  %v483_v27 = vstv %s1364_s0  ;;  %s1389_s24 = sld [smem:[#allocation2 + $0x5]]  ;;  %v453_v57 = vmul.f32 0.2, %v451_v43  ;;  %vm452_vm3 = vcmp.gt.f32.partialorder %v451_v43, 0.0 }
  0x86   : > { %v477_v29 = vadd.f32 %v476_v22, %v473_v18  ;;  %v484_v30 = vmul.f32 %v1298_v10, %v483_v27  ;;  %s1392_s11 = sld [smem:[#allocation2 + $0x85]]  ;;  %v464_v8 = vstv %s1368_s2 }
  0x87   : > { %s1395_s13 = sld [smem:[#allocation2 + $0x105]]  ;;  %v454_v11 = vsel %vm452_vm3, %v451_v43, %v453_v57  ;;  %v468_v15 = vstv %s1371_s29 }
  0x88   : > { %v481_v36 = vadd.f32 %v480_v26, %v477_v29  ;;  %s1397_s1 = sld [smem:[#allocation2 + $0x185]]  ;;  %v487_v48 = vstv %s1376_s16  ;;  %v457_v21 = vmul.f32 %v456_v2, %v454_v11  ;;  %v461_v22 = vmul.f32 %v460_v7, %v454_v11 }
  0x89   : > { %s1401_s12 = sld [smem:[#allocation7 + $0x202]]  ;;  %v493_v17 = vstv %s1380_s25  ;;  %v465_v29 = vmul.f32 %v464_v8, %v454_v11 }
  0x8a   : > { %v485_v44 = vadd.f32 %v484_v30, %v481_v36  ;;  %s1405_s20 = sld [smem:[#allocation7 + $0x203]]  ;;  %v497_v18 = vstv %s1384_s17  ;;  %v469_v30 = vmul.f32 %v468_v15, %v454_v11  ;;  %v458_v37 = vadd.f32 %v457_v21, %v421_v4 }
  0x8b   : > { %s1408_s4 = sld [smem:[#allocation6 + $0x5]]  ;;  %v509_v51 = vstv %s1389_s24  ;;  %v462_v38 = vadd.f32 %v461_v22, %v425_v5  ;;  %v466_v43 = vadd.f32 %v465_v29, %v429_v9 }
  0x8c   : > { %v512_v52 = vstv %s1392_s11  ;;  %s1412_s22 = sld [smem:[#allocation7 + $0x280]]  ;;  %v510_v54 = vmul.f32 %v509_v51, %v1277_v0  ;;  %v488_v58 = vadd.f32 %v487_v48, %v485_v44  ;;  %v470_v44 = vadd.f32 %v469_v30, %v433_v14 }
  0x8d   : > { %v513_v55 = vmul.f32 %v1281_v1, %v512_v52  ;;  %v516_v56 = vstv %s1395_s13  ;;  %s1417_s10 = sld [smem:[#allocation7 + $0x281]] }
  0x8e   : > { %v517_v59 = vmul.f32 %v1289_v6, %v516_v56  ;;  %v520_v60 = vstv %s1397_s1  ;;  %s1421_s14 = sld [smem:[#allocation2 + $0x6]]  ;;  %v490_v12 = vmul.f32 0.2, %v488_v58  ;;  %vm489_vm4 = vcmp.gt.f32.partialorder %v488_v58, 0.0 }
  0x8f   : > { %v514_v63 = vadd.f32 %v513_v55, %v510_v54  ;;  %s1423_s8 = sld [smem:[#allocation2 + $0x86]]  ;;  %v521_v3 = vmul.f32 %v1298_v10, %v520_v60  ;;  %v501_v33 = vstv %s1401_s12 }
  0x90   : > { %s1427_s26 = sld [smem:[#allocation2 + $0x106]]  ;;  %v491_v25 = vsel %vm489_vm4, %v488_v58, %v490_v12  ;;  %v505_v34 = vstv %s1405_s20  ;;  %s290_s20 = sand.u32 1, %s1091_s19  }
  0x91   : > { %s1431_s9 = sld [smem:[#allocation2 + $0x186]]  ;;  %v518_v13 = vadd.f32 %v517_v59, %v514_v63  ;;  %v524_v16 = vstv %s1408_s4  ;;  %v494_v39 = vmul.f32 %v493_v17, %v491_v25  ;;  %v498_v40 = vmul.f32 %v497_v18, %v491_v25  ;;  %s779_s4 = sshll.u32 %s290_s20, 3 }
  0x92   : > { %s1433_s7 = sld [smem:[#allocation7 + $0x282]]  ;;  %v502_v46 = vmul.f32 %v501_v33, %v491_v25  ;;  %v506_v47 = vmul.f32 %v505_v34, %v491_v25  ;;  %v530_v48 = vstv %s1412_s22  ;;  %s866_s22 = sshll.u32 %s1099_s21, 7 }
  0x93   : > { %s1437_s15 = sld [smem:[#allocation6 + $0x6]]  ;;  %v522_v19 = vadd.f32 %v521_v3, %v518_v13  ;;  %v495_v50 = vadd.f32 %v494_v39, %v458_v37  ;;  %v499_v51 = vadd.f32 %v498_v40, %v462_v38  ;;  %v534_v52 = vstv %s1417_s10  ;;  %s292_s10 = scalar_lea.vmem [#allocation10], %s779_s4 }
  0x94   : > { %s1441_s3 = sld [smem:[#allocation7 + $0x283]]  ;;  %v546_v20 = vstv %s1421_s14  ;;  %v503_v62 = vadd.f32 %v502_v46, %v466_v43  ;;  %v507_v4 = vadd.f32 %v506_v47, %v470_v44  ;;  %s647_s14 = sshll.u32 %s292_s10, 4  ;;  %s1504_s14 = int_to_ptr.vmem [resolvable:$true] %s647_s14 }
  0x95   : > { %v547_v23 = vmul.f32 %v546_v20, %v1277_v0  ;;  %v549_v24 = vstv %s1423_s8  ;;  %s1446_s6 = sld [smem:[#allocation7 + $0x300]]  ;;  %v525_v26 = vadd.f32 %v524_v16, %v522_v19  ;;  %s631_s21 = scalar_lea.sflag [#allocation3], %s290_s20 }
  0x96   : > { %v550_v27 = vmul.f32 %v1281_v1, %v549_v24  ;;  %v553_v28 = vstv %s1427_s26  ;;  %s1450_s27 = sld [smem:[#allocation7 + $0x301]] }
  0x97   : > { %v554_v31 = vmul.f32 %v1289_v6, %v553_v28  ;;  %v557_v32 = vstv %s1431_s9  ;;  %s1454_s0 = sld [smem:[#allocation2 + $0x7]]  ;;  %v527_v41 = vmul.f32 0.2, %v525_v26  ;;  %vm526_vm5 = vcmp.gt.f32.partialorder %v525_v26, 0.0  ;;  %s1502_s9 = scalar_lea.hbm %s1555_s5, %s866_s22 }
  0x98   : > { %v551_v35 = vadd.f32 %v550_v27, %v547_v23  ;;  %v558_v36 = vmul.f32 %v1298_v10, %v557_v32  ;;  %s849_s2 = sld [smem:[#allocation2 + $0x87]]  ;;  %v538_v53 = vstv %s1433_s7  ;;  %v619_v28 = vlaneseq  ;;  %s1019_s7 = scalar_lea.vmem %s1504_s14, 128 }
  0x99   : > { %s850_s29 = sld [smem:[#allocation2 + $0x107]]  ;;  %v561_v45 = vstv %s1437_s15  ;;  %v528_v54 = vsel %vm526_vm5, %v525_v26, %v527_v41  ;;  %p1020_p10 = scmp.ne.s32.totalorder %s1504_s14, %s1019_s7 }
  0x9a   : > { %v555_v42 = vadd.f32 %v554_v31, %v551_v35  ;;  %s1459_s16 = sld [smem:[#allocation2 + $0x187]]  ;;  %v542_v58 = vstv %s1441_s3  ;;  %v531_v5 = vmul.f32 %v530_v48, %v528_v54  ;;  %v539_v7 = vmul.f32 %v538_v53, %v528_v54  ;;  %s1113_s15 = smov [#allocation10]  }
  0x9b   : > { %s1462_s25 = sld [smem:[#allocation7 + $0x302]]  ;;  %v543_v8 = vmul.f32 %v542_v58, %v528_v54  ;;  %vm621_vm8 = vcmp.lt.s32.totalorder %v619_v28, 256  ;;  %p1021_p11 = pnand %p1020_p10, %p1184_p4 }
  0x9c   : > { %v559_v49 = vadd.f32 %v558_v36, %v555_v42  ;;  %s1465_s17 = sld [smem:[#allocation7 + $0x303]]  ;;  %v571_v11 = vstv %s1450_s27  ;;  %v532_v16 = vadd.f32 %v531_v5, %v495_v50  ;;  %v540_v19 = vadd.f32 %v539_v7, %v503_v62  ;;  %s1023_s3 = sshll.u32 %s1113_s15, 4  ;;  %s1024_s3 = int_to_ptr.vmem [resolvable:$false] %s1023_s3 }
  0x9d   : > { %s1469_s24 = sld [smem:[#allocation6 + $0x7]]  ;;  %v583_v56 = vstv %s1454_s0  ;;  %p1022_p13 = pneg %p1021_p11 }
  0x9e   : > { %v562_v55 = vadd.f32 %v561_v45, %v559_v49  ;;  %v586_v57 = vstv %s849_s2  ;;  %v584_v59 = vmul.f32 %v583_v56, %v1277_v0  ;;  %s1475_s11 = sld [smem:[#allocation7 + $0x380]]  ;;  %p1026_p1 = scmp.lt.s32.totalorder %s1504_s14, %s1024_s3 }
  0x9f   : > { %v587_v60 = vmul.f32 %v1281_v1, %v586_v57  ;;  %v590_v61 = vstv %s850_s29  ;;  %s1479_s13 = sld [smem:[#allocation7 + $0x381]]  ;;  %v535_v1 = vmul.f32 %v534_v52, %v528_v54 }
  0xa0   : > { %v564_v63 = vmul.f32 0.2, %v562_v55  ;;  %v591_v2 = vmul.f32 %v1289_v6, %v590_v61  ;;  %v594_v3 = vstv %s1459_s16  ;;  %vm563_vm6 = vcmp.gt.f32.partialorder %v562_v55, 0.0  ;;  %s1481_s1 = sld [smem:[#allocation7 + $0x382]] }
  0xa1   : > { %v588_v0 = vadd.f32 %v587_v60, %v584_v59  ;;  %v595_v9 = vmul.f32 %v1298_v10, %v594_v3  ;;  %s1484_s12 = sld [smem:[#allocation7 + $0x383]]  ;;  %v567_v6 = vstv %s1446_s6  ;;  %v575_v13 = vstv %s1462_s25  ;;  %s1025_s6 = scalar_lea.vmem %s1024_s3, 256 }
  0xa2   : > { %v565_v12 = vsel %vm563_vm6, %v562_v55, %v564_v63  ;;  %v579_v14 = vstv %s1465_s17  ;;  %v536_v18 = vadd.f32 %v535_v1, %v499_v51  ;;  %v544_v10 = vadd.f32 %v543_v8, %v507_v4  ;;  %p1027_p6 = scmp.lt.s32.totalorder %s1025_s6, %s1019_s7 }
  0xa3   : > { %v592_v15 = vadd.f32 %v591_v2, %v588_v0  ;;  %v598_v17 = vstv %s1469_s24  ;;  %v568_v21 = vmul.f32 %v567_v6, %v565_v12  ;;  %v572_v22 = vmul.f32 %v571_v11, %v565_v12 }
  0xa4   : > { %v576_v23 = vmul.f32 %v575_v13, %v565_v12  ;;  %v580_v24 = vmul.f32 %v579_v14, %v565_v12  ;;  %v604_v26 = vstv %s1475_s11  ;;  %p1028_p7 = por %p1027_p6, %p1026_p1 }
  0xa5   : > { %v596_v20 = vadd.f32 %v595_v9, %v592_v15  ;;  %v608_v27 = vstv %s1479_s13  ;;  %v569_v32 = vadd.f32 %v568_v21, %v532_v16  ;;  %v573_v33 = vadd.f32 %v572_v22, %v536_v18 }
  0xa6   : > { %v612_v30 = vstv %s1481_s1  ;;  %v577_v34 = vadd.f32 %v576_v23, %v540_v19  ;;  %v581_v35 = vadd.f32 %v580_v24, %v544_v10  ;;  %p1029_p9 = pnand %p1028_p7, %p1022_p13 }
  0xa7   : > { %v599_v25 = vadd.f32 %v598_v17, %v596_v20  ;;  %v616_v31 = vstv %s1484_s12 }
  0xa9   : > { %vm600_vm7 = vcmp.gt.f32.partialorder %v599_v25, 0.0  ;;  %v601_v29 = vmul.f32 0.2, %v599_v25 }
  0xab   : > { %v602_v36 = vsel %vm600_vm7, %v599_v25, %v601_v29 }
  0xac   : > { %v605_v37 = vmul.f32 %v604_v26, %v602_v36  ;;  %v609_v38 = vmul.f32 %v608_v27, %v602_v36  ;;  %v613_v39 = vmul.f32 %v612_v30, %v602_v36  ;;  %v617_v40 = vmul.f32 %v616_v31, %v602_v36 }
  0xae   : > { %v606_v41 = vadd.f32 %v605_v37, %v569_v32  ;;  %v610_v42 = vadd.f32 %v609_v38, %v573_v33  ;;  %v614_v43 = vadd.f32 %v613_v39, %v577_v34  ;;  %v618_v44 = vadd.f32 %v617_v40, %v581_v35 }
  0xb0   : > { %623 = vst.msk [vmem:[%s292_s10] ss:$4 sm:$0x3] %vm621_vm8, %v606_v41  ;;  %857 = vst.msk [vmem:[%s292_s10 + $0x1] ss:$4 sm:$0x3] %vm621_vm8, %v610_v42 }
  0xb1   : > { %858 = vst.msk [vmem:[%s292_s10 + $0x2] ss:$4 sm:$0x3] %vm621_vm8, %v614_v43  ;;  %859 = vst.msk [vmem:[%s292_s10 + $0x3] ss:$4 sm:$0x3] %vm621_vm8, %v618_v44 }
  0xb2   : > { %1032 = shalt.err (!%p1029_p9)
}
  0xb3   : > { %s1033_s27 = scalar_lea.hbm %s1502_s9, 128  ;;  %s1037_s29 = scalar_lea.hbm %s1555_s5, 256 }
  0xb4   : > { %p1034_p12 = scmp.ne.s32.totalorder %s1502_s9, %s1033_s27  ;;  %p1038_p2 = scmp.lt.s32.totalorder %s1502_s9, %s1555_s5 }
  0xb5   : > { %p1039_p5 = scmp.lt.s32.totalorder %s1037_s29, %s1033_s27 }
  0xb6   : > { %p1035_p0 = pnand %p1034_p12, %p1184_p4 }
  0xb7   : > { %p1040_p8 = por %p1039_p5, %p1038_p2 }
  0xb8   : > { %p1036_p3 = pneg %p1035_p0 }
  0xba   : > { %p1041_p10 = pnand %p1040_p8, %p1036_p3 }
  0xbc   : > { %1044 = shalt.err (!%p1041_p10)
}
  0xbd   : > { %883 = dma.vmem_to_hbm [thread:$0]  (%p1184_p4), %s1504_s14, 128, %s1502_s9, %s631_s21  }
  0xbe PF: > { %p910_p11 = scmp.ge.s32.totalorder %s1107_s23, 2  ;;  %s659_s17 = sand.u32 1, %s1087_s18  }
  0xbf   : > { %p1578_p13 = scmp.ne.s32.totalorder %s1568_s30, 0  ;;  %s660_s24 = scalar_lea.sflag [#allocation3], %s659_s17 }
  0xc1   : > { %p899_p1 = pnand %p910_p11, %p1578_p13 }
  0xc3   : > { %p900_p6 = pneg %p899_p1 }
  0xc5   : > { %1082 = dma.done.wait (%p900_p6), %s660_s24, 128  }
  0xc6   : > { %1084 = vsyncadd (%p900_p6), %s660_s24, 4294967168  ;;  %s21_s23 = sadd.s32 1, %s1107_s23   ;;  %s1579_s28 = sld [smem:[#allocation15_spill]] }
  0xc7   : > { %p18_p7 = scmp.ge.s32.totalorder %s21_s23, 4   ;;  %s1580_s20 = sld [smem:[#allocation18_spill]] }
  0xc8   : > { %s1581_s21 = sld [smem:[#allocation16_spill]]  ;;  %s1583_s18 = smov %s1091_s19 }
  0xc9   : > { %s1582_s22 = sld [smem:[#allocation17_spill]]  ;;  %20 = sbr.rel (!%p18_p7) target bundleno = 13 (0xd), region = 99 }
  0xcc   : > { %s1584_s19 = smov %s1579_s28 }
  0xce   :  { %665 = vsyncpa [#allocation3], 1 }
  0xcf   :  { %667 = vsyncpa [#allocation3 + $0x1], 1 }
  0xd0   :  { %668 = vsyncpa [#allocation4], 1 }
  0xd1   :  { %670 = vsyncpa [#allocation4 + $0x1], 1 }
  0xd2   :  { %671 = vsyncpa [#allocation5], 1 }
  0xd3   :  { %673 = vsyncpa [#allocation5 + $0x1], 1 }
  0xd4   :  { %674 = vsyncpa [#allocation8], 1 }

</bundles_post_ra>
